<compile_context>
chip_gen: v6e
topology: v6e:2x2x1
jax: 0.10.0
libtpu: 0.0.40
codegen_flags: <defaults>
</compile_context>

<pallas_src>
import functools

import jax
import jax.numpy as jnp
from jax import lax
from jax.experimental import pallas as pl
from jax.experimental.pallas import tpu as pltpu


def _round_up(x, m):
    return ((x + m - 1) // m) * m


def _focal_kernel(alpha_ref, preds_ref, labels_ref, out_ref, *,
                  gamma, num_classes, hw, rows_per_block, n_inner):
    o = pl.program_id(1)
    i = pl.program_id(2)

    # Output block is resident across the inner (reduction) grid axis and
    # doubles as the per-(batch, outer) partial-sum accumulator.
    @pl.when(i == 0)
    def _():
        out_ref[...] = jnp.zeros_like(out_ref)

    lbl = labels_ref[0]                                   # (R, 128) int32

    # ---- log-softmax over the class axis, unrolled over C class planes ----
    # Running max over classes (VPU, dense (R,128) vregs).
    m = preds_ref[0, 0].astype(jnp.float32)
    for c in range(1, num_classes):
        m = jnp.maximum(m, preds_ref[0, c].astype(jnp.float32))

    # Sum of exps; reuse the per-class exponentials + logits for the one-hot
    # gather (compares + selects against the int label plane, pure VPU).
    se = jnp.zeros_like(m)
    x_t = jnp.zeros_like(m)     # true-class logit
    e_t = jnp.zeros_like(m)     # true-class exp(x - m)
    a_t = jnp.zeros_like(m)     # alpha[label]
    for c in range(num_classes):
        x_c = preds_ref[0, c].astype(jnp.float32)
        e_c = jnp.exp(x_c - m)
        se = se + e_c
        sel = lbl == c
        x_t = jnp.where(sel, x_c, x_t)
        e_t = jnp.where(sel, e_c, e_t)
        a_t = jnp.where(sel, alpha_ref[c], a_t)

    lse = jnp.log(se)                                     # (R, 128)
    logp_t = x_t - m - lse                                # log p_true
    p_t = e_t / se                                        # p_true (reuses exps)

    # (1 - p)^gamma via explicit multiply chain for integer gamma (stays on VPU).
    w = 1.0 - p_t
    if isinstance(gamma, int) and gamma >= 0:
        fw = jnp.ones_like(w)
        for _ in range(gamma):
            fw = fw * w
    else:
        fw = jnp.power(w, jnp.float32(gamma))

    loss = -a_t * fw * logp_t                             # (R, 128)

    # Unconditional mask of padded / out-of-range pixels (handles the pad to a
    # multiple of 128 and any ragged last row-block; jnp.where selecting 0 is
    # safe even if unselected lanes hold inf/NaN garbage).
    blk = o * n_inner + i
    r = loss.shape[0]
    row = blk * rows_per_block + lax.broadcasted_iota(jnp.int32, (r, 128), 0)
    lane = lax.broadcasted_iota(jnp.int32, (r, 128), 1)
    pix = row * 128 + lane
    loss = jnp.where(pix < hw, loss, 0.0)

    out_ref[...] += loss.reshape(out_ref.shape)


def focal_loss_pallas(preds_nchw, labels_bhw, alpha_vec, *, gamma=2,
                      size_average=True, rows_per_block=512):
    """preds_nchw: [B, C, H, W] float, labels_bhw: [B, H, W] int, alpha_vec: [C]."""
    B, C, H, W = preds_nchw.shape
    HW = H * W

    # Pixels on lanes (dense 128-wide rows), classes as separate planes.
    hw_pad = _round_up(HW, 128)          # at worst pad to the next multiple of 128
    n_rows = hw_pad // 128

    preds = preds_nchw.reshape(B, C, HW)
    labels = labels_bhw.reshape(B, HW).astype(jnp.int32)
    if hw_pad != HW:
        preds = jnp.pad(preds, ((0, 0), (0, 0), (0, hw_pad - HW)))
        labels = jnp.pad(labels, ((0, 0), (0, hw_pad - HW)))
    preds = preds.reshape(B, C, n_rows, 128)
    labels = labels.reshape(B, n_rows, 128)

    # Row-block size: full extent if small, else a multiple-of-8 tile (~1 MiB of
    # input per grid step for C=3 at R=512).
    R = n_rows if n_rows <= rows_per_block else rows_per_block
    n_blocks = pl.cdiv(n_rows, R)

    # Split the pixel-block axis into (parallel outer) x (reduction inner) so a
    # single-batch call still feeds both v7x TensorCores.
    n_outer = 2 if (B == 1 and n_blocks >= 2) else 1
    n_inner = pl.cdiv(n_blocks, n_outer)

    alpha_sm = alpha_vec.astype(jnp.float32).reshape(C)   # scalar-prefetch -> SMEM

    kernel = functools.partial(_focal_kernel, gamma=gamma, num_classes=C,
                               hw=HW, rows_per_block=R, n_inner=n_inner)

    partial_sums = pl.pallas_call(
        kernel,
        out_shape=jax.ShapeDtypeStruct((B, n_outer, R, 128), jnp.float32),
        grid_spec=pltpu.PrefetchScalarGridSpec(
            num_scalar_prefetch=1,
            grid=(B, n_outer, n_inner),
            in_specs=[
                pl.BlockSpec((1, C, R, 128),
                             lambda b, o, i, alpha: (b, 0, o * n_inner + i, 0)),
                pl.BlockSpec((1, R, 128),
                             lambda b, o, i, alpha: (b, o * n_inner + i, 0)),
            ],
            out_specs=pl.BlockSpec((1, 1, R, 128),
                                   lambda b, o, i, alpha: (b, o, 0, 0)),
        ),
        compiler_params=pltpu.CompilerParams(
            dimension_semantics=("parallel", "parallel", "arbitrary")),
    )(alpha_sm, preds, labels)

    total = jnp.sum(partial_sums)
    if size_average:
        return total / jnp.float32(B * HW)
    return total


def focal_loss_ref(preds_nchw, labels_bhw, alpha_vec, gamma=2, size_average=True):
    B, C, H, W = preds_nchw.shape
    preds = jnp.transpose(preds_nchw, (0, 2, 3, 1)).reshape(-1, C)
    labels = labels_bhw.reshape(-1)
    logp = jax.nn.log_softmax(preds, axis=1)
    p = jnp.exp(logp)
    idx = jnp.arange(preds.shape[0])
    p_t = p[idx, labels]
    logp_t = logp[idx, labels]
    a_t = alpha_vec[labels]
    loss = -a_t * jnp.power(1.0 - p_t, gamma) * logp_t
    return jnp.mean(loss) if size_average else jnp.sum(loss)


if __name__ == "__main__":
    # module config: alpha=0.25, gamma=2, num_classes=3
    num_classes = 3
    alpha_scalar = 0.25
    gamma = 2
    alpha_vec = jnp.concatenate([
        jnp.array([alpha_scalar], dtype=jnp.float32),
        jnp.full((num_classes - 1,), 1.0 - alpha_scalar, dtype=jnp.float32),
    ])  # [0.25, 0.75, 0.75]

    # segmentation forward: preds [B, C, H, W], labels [B, H, W]
    B, H, W = 2, 16, 16
    key = jax.random.PRNGKey(0)
    k1, k2 = jax.random.split(key)
    preds = jax.random.normal(k1, (B, num_classes, H, W), dtype=jnp.float32)
    labels = jax.random.randint(k2, (B, H, W), 0, num_classes, dtype=jnp.int32)

    # NOTE: out-of-range labels (e.g. an ignore_index such as 255) contribute 0
    # to the sum but are still counted in the size_average denominator, matching
    # the reference PyTorch module (which has no ignore_index handling).
    loss = focal_loss_pallas(preds, labels, alpha_vec, gamma=gamma,
                             size_average=True)
    loss = jax.block_until_ready(loss)

    ref = focal_loss_ref(preds, labels, alpha_vec, gamma=gamma, size_average=True)
    assert jnp.allclose(loss, ref, rtol=1e-5, atol=1e-5), (loss, ref)

    print("KERNEL_OK")
</pallas_src>

<mosaic_0001>
module attributes {stable_mosaic.version = 11 : i64} {
  func.func @_focal_kernel(%arg0: i32, %arg1: i32, %arg2: i32, %arg3: memref<3xf32, #tpu.memory_space<smem>>, %arg4: memref<1x3x2x128xf32, #tpu.memory_space<vmem>>, %arg5: memref<1x2x128xi32, #tpu.memory_space<vmem>>, %arg6: memref<1x1x2x128xf32, #tpu.memory_space<vmem>>) attributes {dimension_semantics = [#tpu.dimension_semantics<parallel>, #tpu.dimension_semantics<parallel>, #tpu.dimension_semantics<arbitrary>], iteration_bounds = array<i64: 2, 1, 1>, scalar_prefetch = 1 : i64, scratch_operands = 0 : i64, tpu.core_type = #tpu.core_type<tc>, window_params = [{transform_indices = @transform_0, window_bounds = array<i64: 1, 3, 2, 128>}, {transform_indices = @transform_1, window_bounds = array<i64: 1, 2, 128>}, {transform_indices = @transform_2, window_bounds = array<i64: 1, 1, 2, 128>}]} {
    %c0_i32 = arith.constant 0 : i32
    %0 = arith.cmpi eq, %arg2, %c0_i32 : i32
    %1 = arith.extui %0 : i1 to i32
    %c0_i32_0 = arith.constant 0 : i32
    %2 = arith.cmpi ne, %1, %c0_i32_0 : i32
    scf.if %2 {
      %cst_46 = arith.constant 0.000000e+00 : f32
      %84 = vector.broadcast %cst_46 : f32 to vector<1x1x2x128xf32>
      %c0_47 = arith.constant 0 : index
      %c0_48 = arith.constant 0 : index
      %c0_49 = arith.constant 0 : index
      %c0_50 = arith.constant 0 : index
      %85 = vector.load %arg6[%c0_47, %c0_48, %c0_49, %c0_50] : memref<1x1x2x128xf32, #tpu.memory_space<vmem>>, vector<1x1x2x128xf32>
      tpu.vector_store %arg6[%c0_47, %c0_48, %c0_49, %c0_50], %84 {strides = array<i32>} : memref<1x1x2x128xf32, #tpu.memory_space<vmem>>, vector<1x1x2x128xf32>,
    } else {
    }
    %c0 = arith.constant 0 : index
    %c0_1 = arith.constant 0 : index
    %c0_2 = arith.constant 0 : index
    %3 = vector.load %arg5[%c0, %c0_1, %c0_2] : memref<1x2x128xi32, #tpu.memory_space<vmem>>, vector<1x2x128xi32>
    %4 = vector.shape_cast %3 : vector<1x2x128xi32> to vector<2x128xi32>
    %c0_3 = arith.constant 0 : index
    %c0_4 = arith.constant 0 : index
    %c0_5 = arith.constant 0 : index
    %c0_6 = arith.constant 0 : index
    %5 = vector.load %arg4[%c0_3, %c0_4, %c0_5, %c0_6] : memref<1x3x2x128xf32, #tpu.memory_space<vmem>>, vector<1x1x2x128xf32>
    %6 = vector.shape_cast %5 : vector<1x1x2x128xf32> to vector<2x128xf32>
    %c0_7 = arith.constant 0 : index
    %c1 = arith.constant 1 : index
    %c0_8 = arith.constant 0 : index
    %c0_9 = arith.constant 0 : index
    %7 = vector.load %arg4[%c0_7, %c1, %c0_8, %c0_9] : memref<1x3x2x128xf32, #tpu.memory_space<vmem>>, vector<1x1x2x128xf32>
    %8 = vector.shape_cast %7 : vector<1x1x2x128xf32> to vector<2x128xf32>
    %9 = arith.maximumf %6, %8 : vector<2x128xf32>
    %c0_10 = arith.constant 0 : index
    %c2 = arith.constant 2 : index
    %c0_11 = arith.constant 0 : index
    %c0_12 = arith.constant 0 : index
    %10 = vector.load %arg4[%c0_10, %c2, %c0_11, %c0_12] : memref<1x3x2x128xf32, #tpu.memory_space<vmem>>, vector<1x1x2x128xf32>
    %11 = vector.shape_cast %10 : vector<1x1x2x128xf32> to vector<2x128xf32>
    %12 = arith.maximumf %9, %11 : vector<2x128xf32>
    %cst = arith.constant 0.000000e+00 : f32
    %13 = vector.broadcast %cst : f32 to vector<2x128xf32>
    %cst_13 = arith.constant 0.000000e+00 : f32
    %14 = vector.broadcast %cst_13 : f32 to vector<2x128xf32>
    %cst_14 = arith.constant 0.000000e+00 : f32
    %15 = vector.broadcast %cst_14 : f32 to vector<2x128xf32>
    %cst_15 = arith.constant 0.000000e+00 : f32
    %16 = vector.broadcast %cst_15 : f32 to vector<2x128xf32>
    %c0_16 = arith.constant 0 : index
    %c0_17 = arith.constant 0 : index
    %c0_18 = arith.constant 0 : index
    %c0_19 = arith.constant 0 : index
    %17 = vector.load %arg4[%c0_16, %c0_17, %c0_18, %c0_19] : memref<1x3x2x128xf32, #tpu.memory_space<vmem>>, vector<1x1x2x128xf32>
    %18 = vector.shape_cast %17 : vector<1x1x2x128xf32> to vector<2x128xf32>
    %19 = arith.subf %18, %12 : vector<2x128xf32>
    %20 = math.exp %19 : vector<2x128xf32>
    %21 = arith.addf %13, %20 : vector<2x128xf32>
    %c0_i32_20 = arith.constant 0 : i32
    %22 = vector.broadcast %c0_i32_20 : i32 to vector<2x128xi32>
    %23 = arith.cmpi eq, %4, %22 : vector<2x128xi32>
    %24 = arith.select %23, %18, %14 : vector<2x128xi1>, vector<2x128xf32>
    %25 = arith.select %23, %20, %15 : vector<2x128xi1>, vector<2x128xf32>
    %c0_21 = arith.constant 0 : index
    %26 = memref.load %arg3[%c0_21] : memref<3xf32, #tpu.memory_space<smem>>
    %27 = vector.broadcast %26 : f32 to vector<2x128xf32>
    %28 = arith.select %23, %27, %16 : vector<2x128xi1>, vector<2x128xf32>
    %c0_22 = arith.constant 0 : index
    %c1_23 = arith.constant 1 : index
    %c0_24 = arith.constant 0 : index
    %c0_25 = arith.constant 0 : index
    %29 = vector.load %arg4[%c0_22, %c1_23, %c0_24, %c0_25] : memref<1x3x2x128xf32, #tpu.memory_space<vmem>>, vector<1x1x2x128xf32>
    %30 = vector.shape_cast %29 : vector<1x1x2x128xf32> to vector<2x128xf32>
    %31 = arith.subf %30, %12 : vector<2x128xf32>
    %32 = math.exp %31 : vector<2x128xf32>
    %33 = arith.addf %21, %32 : vector<2x128xf32>
    %c1_i32 = arith.constant 1 : i32
    %34 = vector.broadcast %c1_i32 : i32 to vector<2x128xi32>
    %35 = arith.cmpi eq, %4, %34 : vector<2x128xi32>
    %36 = arith.select %35, %30, %24 : vector<2x128xi1>, vector<2x128xf32>
    %37 = arith.select %35, %32, %25 : vector<2x128xi1>, vector<2x128xf32>
    %c1_26 = arith.constant 1 : index
    %38 = memref.load %arg3[%c1_26] : memref<3xf32, #tpu.memory_space<smem>>
    %39 = vector.broadcast %38 : f32 to vector<2x128xf32>
    %40 = arith.select %35, %39, %28 : vector<2x128xi1>, vector<2x128xf32>
    %c0_27 = arith.constant 0 : index
    %c2_28 = arith.constant 2 : index
    %c0_29 = arith.constant 0 : index
    %c0_30 = arith.constant 0 : index
    %41 = vector.load %arg4[%c0_27, %c2_28, %c0_29, %c0_30] : memref<1x3x2x128xf32, #tpu.memory_space<vmem>>, vector<1x1x2x128xf32>
    %42 = vector.shape_cast %41 : vector<1x1x2x128xf32> to vector<2x128xf32>
    %43 = arith.subf %42, %12 : vector<2x128xf32>
    %44 = math.exp %43 : vector<2x128xf32>
    %45 = arith.addf %33, %44 : vector<2x128xf32>
    %c2_i32 = arith.constant 2 : i32
    %46 = vector.broadcast %c2_i32 : i32 to vector<2x128xi32>
    %47 = arith.cmpi eq, %4, %46 : vector<2x128xi32>
    %48 = arith.select %47, %42, %36 : vector<2x128xi1>, vector<2x128xf32>
    %49 = arith.select %47, %44, %37 : vector<2x128xi1>, vector<2x128xf32>
    %c2_31 = arith.constant 2 : index
    %50 = memref.load %arg3[%c2_31] : memref<3xf32, #tpu.memory_space<smem>>
    %51 = vector.broadcast %50 : f32 to vector<2x128xf32>
    %52 = arith.select %47, %51, %40 : vector<2x128xi1>, vector<2x128xf32>
    %53 = math.log %45 : vector<2x128xf32>
    %54 = arith.subf %48, %12 : vector<2x128xf32>
    %55 = arith.subf %54, %53 : vector<2x128xf32>
    %56 = arith.divf %49, %45 : vector<2x128xf32>
    %cst_32 = arith.constant 1.000000e+00 : f32
    %57 = vector.broadcast %cst_32 : f32 to vector<2x128xf32>
    %58 = arith.subf %57, %56 : vector<2x128xf32>
    %cst_33 = arith.constant 1.000000e+00 : f32
    %59 = vector.broadcast %cst_33 : f32 to vector<2x128xf32>
    %60 = arith.mulf %59, %58 : vector<2x128xf32>
    %61 = arith.mulf %60, %58 : vector<2x128xf32>
    %cst_34 = arith.constant 0.000000e+00 : f32
    %62 = vector.broadcast %cst_34 : f32 to vector<2x128xf32>
    %63 = arith.subf %62, %52 : vector<2x128xf32>
    %64 = arith.mulf %63, %61 : vector<2x128xf32>
    %65 = arith.mulf %64, %55 : vector<2x128xf32>
    %c1_i32_35 = arith.constant 1 : i32
    %66 = arith.muli %arg1, %c1_i32_35 : i32
    %67 = arith.addi %66, %arg2 : i32
    %c2_i32_36 = arith.constant 2 : i32
    %68 = arith.muli %67, %c2_i32_36 : i32
    %69 = tpu.iota {dimensions = array<i32: 0>} : vector<2x128xi32>
    %70 = vector.broadcast %68 : i32 to vector<2x128xi32>
    %71 = arith.addi %70, %69 : vector<2x128xi32>
    %72 = tpu.iota {dimensions = array<i32: 1>} : vector<2x128xi32>
    %c128_i32 = arith.constant 128 : i32
    %73 = vector.broadcast %c128_i32 : i32 to vector<2x128xi32>
    %74 = arith.muli %71, %73 : vector<2x128xi32>
    %75 = arith.addi %74, %72 : vector<2x128xi32>
    %c256_i32 = arith.constant 256 : i32
    %76 = vector.broadcast %c256_i32 : i32 to vector<2x128xi32>
    %77 = arith.cmpi slt, %75, %76 : vector<2x128xi32>
    %cst_37 = arith.constant 0.000000e+00 : f32
    %78 = vector.broadcast %cst_37 : f32 to vector<2x128xf32>
    %79 = arith.select %77, %65, %78 : vector<2x128xi1>, vector<2x128xf32>
    %c0_38 = arith.constant 0 : index
    %c0_39 = arith.constant 0 : index
    %c0_40 = arith.constant 0 : index
    %c0_41 = arith.constant 0 : index
    %80 = vector.load %arg6[%c0_38, %c0_39, %c0_40, %c0_41] : memref<1x1x2x128xf32, #tpu.memory_space<vmem>>, vector<1x1x2x128xf32>
    %81 = vector.shape_cast %79 : vector<2x128xf32> to vector<1x1x2x128xf32>
    %82 = arith.addf %80, %81 : vector<1x1x2x128xf32>
    %c0_42 = arith.constant 0 : index
    %c0_43 = arith.constant 0 : index
    %c0_44 = arith.constant 0 : index
    %c0_45 = arith.constant 0 : index
    %83 = vector.load %arg6[%c0_42, %c0_43, %c0_44, %c0_45] : memref<1x1x2x128xf32, #tpu.memory_space<vmem>>, vector<1x1x2x128xf32>
    tpu.vector_store %arg6[%c0_42, %c0_43, %c0_44, %c0_45], %82 {strides = array<i32>} : memref<1x1x2x128xf32, #tpu.memory_space<vmem>>, vector<1x1x2x128xf32>,
    return
  }
  func.func @transform_0(%arg0: i32, %arg1: i32, %arg2: i32, %arg3: memref<3xf32, #tpu.memory_space<smem>>) -> (i32, i32, i32, i32) {
    %c1_i32 = arith.constant 1 : i32
    %0 = arith.muli %arg1, %c1_i32 : i32
    %1 = arith.addi %0, %arg2 : i32
    %c0_i32 = arith.constant 0 : i32
    %c0_i32_0 = arith.constant 0 : i32
    %c0_i32_1 = arith.constant 0 : i32
    return %arg0, %c0_i32, %1, %c0_i32_0 : i32, i32, i32, i32
  }
  func.func @transform_1(%arg0: i32, %arg1: i32, %arg2: i32, %arg3: memref<3xf32, #tpu.memory_space<smem>>) -> (i32, i32, i32) {
    %c1_i32 = arith.constant 1 : i32
    %0 = arith.muli %arg1, %c1_i32 : i32
    %1 = arith.addi %0, %arg2 : i32
    %c0_i32 = arith.constant 0 : i32
    %c0_i32_0 = arith.constant 0 : i32
    return %arg0, %1, %c0_i32 : i32, i32, i32
  }
  func.func @transform_2(%arg0: i32, %arg1: i32, %arg2: i32, %arg3: memref<3xf32, #tpu.memory_space<smem>>) -> (i32, i32, i32, i32) {
    %c0_i32 = arith.constant 0 : i32
    %c0_i32_0 = arith.constant 0 : i32
    %c0_i32_1 = arith.constant 0 : i32
    return %arg0, %arg1, %c0_i32, %c0_i32_0 : i32, i32, i32, i32
  }
}

</mosaic_0001>

<bundles_post_ra>
// kernel: tpu_custom_call.1
= control target key start
LH: loop header
LB: loop body
LE: loop exit
PB: predicated region body
PF: predicated region fallthrough
CT: control target
= control target key end

     0   :  { %s687_s12 = smov [#allocation3]   ;;  %s885_s0 = inlined_call_operand.hbm [shape: f32[3], index: 0, kind: input, shape index: {}]   ;;  %s886_s1 = inlined_call_operand.hbm [shape: f32[2,3,2,128], index: 1, kind: input, shape index: {}]   ;;  %s887_s2 = inlined_call_operand.hbm [shape: s32[2,2,128], index: 2, kind: input, shape index: {}]   ;;  %s888_s3 = inlined_call_operand.hbm [shape: f32[2,1,2,128], index: 3, kind: output, shape index: {}]  }
   0x1   :  { %9 = dma.hbm_to_smem %s885_s0, 16, %s687_s12, [#allocation2] }
   0x2   :  { %649 = dma.done.wait [#allocation2], 16 }
   0x3   :  { %650 = vsyncadd [#allocation2], 4294967280 }
   0x4   :  { %11 = sfence }
   0x5   :  { %12 = vsyncpa [#allocation5], 0 }
   0x6   :  { %14 = vsyncpa [#allocation5 + $0x1], 0 }
   0x7   :  { %15 = vsyncpa [#allocation8], 0 }
   0x8   :  { %17 = vsyncpa [#allocation8 + $0x1], 0 }
   0x9   :  { %18 = vsyncpa [#allocation6], 0 }
   0xa   :  { %20 = vsyncpa [#allocation6 + $0x1], 0  ;;  %s717_s15 = smov 0   ;;  %s719_s16 = smov 0  }
   0xb   :  { %s721_s17 = smov 0   ;;  %s723_s18 = smov 0  }
   0xc   :  { %s725_s19 = smov 0   ;;  %s727_s0 = smov 0  }
   0xd LB: > { %s433_s20 = sadd.s32 4294967295, %s685_s0   ;;  %s434_s21 = sadd.s32 4294967294, %s685_s0   ;;  %s685_s0 = sphi %s727_s0, %s26_s0   ;;  %s681_s19 = sphi %s725_s19, %s900_s19   ;;  %s677_s18 = sphi %s723_s18, %s899_s18   ;;  %s673_s17 = sphi %s721_s17, %s898_s17   ;;  %s669_s16 = sphi %s719_s16, %s897_s16   ;;  %s665_s15 = sphi %s717_s15, %s896_s15  }
   0xe   : > { %s45_s22 = sadd.s32 1, %s681_s19  ;;  %s56_s23 = sadd.s32 1, %s673_s17 }
   0xf   : > { %p47_p0 = scmp.ge.s32.totalorder %s45_s22, 2  ;;  %p63_p1 = scmp.ne.s32.totalorder %s673_s17, %s669_s16 }
  0x10   : > { %p64_p2 = scmp.eq.s32.totalorder %s685_s0, 0  ;;  %p69_p3 = scmp.ne.s32.totalorder %s669_s16, %s665_s15 }
  0x11   : > { %s902_s22 = smov (%p47_p0, %s45_s22), 0  ;;  %p70_p5 = scmp.eq.s32.totalorder %s433_s20, 0 }
  0x12   : > { %p758_p4 = por %p64_p2, %p63_p1  ;;  %s51_s25 = ssub.s32 %s681_s19, %s902_s22 }
  0x13   : > { %p125_p6 = scmp.eq.s32.totalorder %s433_s20, 1  ;;  %p54_p7 = scmp.eq.s32.totalorder %s51_s25, 0 }
  0x14   : > { %p764_p8 = por %p70_p5, %p69_p3  ;;  %p131_p10 = scmp.eq.s32.totalorder %s434_s21, 1 }
  0x15   : > { %p768_p9 = por %p125_p6, %p63_p1  ;;  %p471_p13 = scmp.lt.s32.totalorder %s685_s0, 2 }
  0x16   : > { %s773_s28 = scalar_select %p54_p7, %s673_s17, %s56_s23  }
  0x17   : > { %p775_p11 = por %p131_p10, %p69_p3  ;;  %s782_s30 = sand.u32 1, %s673_s17  }
  0x18   : > { %s451_s4 = smul.u32 6, %s782_s30  ;;  %p788_p0 = pnand %p471_p13, %p758_p4 }
  0x19   : > { %s452_s5 = smul.u32 96, %s681_s19  ;;  %p440_p1 = scmp.ge.s32.totalorder %s685_s0, 1 }
  0x1a   : > { %s155_s10 = scalar_lea.vmem [#allocation4], %s451_s4  ;;  %s152_s12 = scalar_lea.sflag [#allocation5], %s782_s30 }
  0x1b   : > { %s163_s9 = scalar_lea.hbm %s886_s1, %s452_s5  ;;  %s164_s11 = sshll.u32 %s155_s10, 4  ;;  %s165_s11 = int_to_ptr.vmem [resolvable:$true] %s164_s11 }
  0x1c   : > { %p545_p2 = pneg %p788_p0  ;;  %s556_s13 = scalar_lea.vmem %s165_s11, 96 }
  0x1d   : > { %p557_p3 = scmp.ne.s32.totalorder %s165_s11, %s556_s13  ;;  %s688_s14 = smov [#allocation4]  }
  0x1e   : > { %s561_s20 = sshll.u32 %s688_s14, 4  ;;  %s562_s20 = int_to_ptr.vmem [resolvable:$false] %s561_s20 }
  0x1f   : > { %p559_p4 = pnand %p557_p3, %p545_p2  ;;  %s563_s21 = scalar_lea.vmem %s562_s20, 192 }
  0x20   : > { %p564_p6 = scmp.lt.s32.totalorder %s165_s11, %s562_s20  ;;  %p565_p7 = scmp.lt.s32.totalorder %s563_s21, %s556_s13 }
  0x21   : > { %p560_p5 = pneg %p559_p4 }
  0x22   : > { %p566_p10 = por %p565_p7, %p564_p6 }
  0x24   : > { %p567_p13 = pnand %p566_p10, %p560_p5 }
  0x26   : > { %570 = shalt.err (!%p567_p13)
}
  0x27   : > { %s689_s23 = smov 32   ;;  %s690_s24 = smov 2  }
  0x28   : > { %463 = dma.hbm_to_vmem [thread:$0]  (!%p788_p0), %s163_s9, 96, %s165_s11, %s152_s12, %s689_s23, %s689_s23, %s690_s24  }
  0x29   : > { %p192_p3 = scmp.lt.s32.totalorder %s685_s0, 3  ;;  %s438_s25 = sshll.u32 %s782_s30, 1 }
  0x2a   : > { %s439_s4 = sshll.u32 %s681_s19, 5  ;;  %s178_s13 = scalar_lea.vmem [#allocation7], %s438_s25 }
  0x2b   : > { %p809_p4 = pnand %p440_p1, %p192_p3  ;;  %s185_s10 = scalar_lea.hbm %s887_s2, %s439_s4 }
  0x2c   : > { %s187_s14 = sshll.u32 %s178_s13, 4  ;;  %s175_s20 = scalar_lea.sflag [#allocation8], %s782_s30  ;;  %s188_s14 = int_to_ptr.vmem [resolvable:$true] %s187_s14 }
  0x2d   : > { %s584_s21 = scalar_lea.vmem %s188_s14, 32  ;;  %s691_s9 = smov [#allocation7]  }
  0x2e   : > { %p585_p5 = scmp.ne.s32.totalorder %s188_s14, %s584_s21  ;;  %s589_s11 = sshll.u32 %s691_s9, 4  ;;  %s590_s11 = int_to_ptr.vmem [resolvable:$false] %s589_s11 }
  0x2f   : > { %s591_s12 = scalar_lea.vmem %s590_s11, 64  ;;  %p592_p1 = scmp.lt.s32.totalorder %s188_s14, %s590_s11 }
  0x30   : > { %p587_p6 = pnand %p585_p5, %p545_p2  ;;  %p593_p10 = scmp.lt.s32.totalorder %s591_s12, %s584_s21 }
  0x32   : > { %p588_p7 = pneg %p587_p6  ;;  %p594_p13 = por %p593_p10, %p592_p1 }
  0x34   : > { %p595_p3 = pnand %p594_p13, %p588_p7 }
  0x36   : > { %598 = shalt.err (!%p595_p3)
}
  0x37   : > { %466 = dma.hbm_to_vmem [thread:$0]  (!%p788_p0), %s185_s10, 32, %s188_s14, %s175_s20  }
  0x38   : > { %196 = sbr.rel (%p809_p4) target bundleno = 135 (0x87), region = 28  ;;  %s825_s30 = sand.u32 (!%p809_p4), 1, %s669_s16  }
  0x39   : > { %s453_s23 = smul.u32 (!%p809_p4), 6, %s825_s30  ;;  %s199_s24 = scalar_lea.sflag (!%p809_p4), [#allocation5], %s825_s30 }
  0x3b   : > { %s202_s25 = scalar_lea.vmem (!%p809_p4), [#allocation4], %s453_s23 }
  0x3d   : > { %652 = dma.done.wait (%p764_p8), %s199_s24, 96  }
  0x3e   : > { %654 = vsyncadd (%p764_p8), %s199_s24, 4294967200  ;;  %s441_s6 = sshll.u32 %s825_s30, 1  ;;  %s208_s4 = scalar_lea.sflag [#allocation8], %s825_s30 }
  0x3f   : > { %s211_s5 = scalar_lea.vmem [#allocation7], %s441_s6 }
  0x40   : > { %656 = dma.done.wait (%p764_p8), %s208_s4, 32  }
  0x41   : > { %658 = vsyncadd (%p764_p8), %s208_s4, 4294967264  ;;  %s839_s7 = scalar_lea.vmem [#allocation9], %s441_s6  ;;  %v692_v0 = vmov 0.0   ;;  %v245_v1 = vld [vmem:[%s202_s25] sm:$0x3]  ;;  %s259_s26 = sld [smem:[#allocation3]]  ;;  %v295_v21 = vlaneseq }
  0x42   : > { %243 = vst [vmem:[%s839_s7] sm:$0x3] %v692_v0  ;;  %v443_v2 = vld [vmem:[%s202_s25 + $0x2] sm:$0x3]  ;;  %v444_v4 = vld [vmem:[%s202_s25 + $0x4] sm:$0x3]  ;;  %s445_s8 = sld [smem:[#allocation3 + $0x1]] }
  0x43   : > { %v248_v3 = vmax.f32 %v245_v1, %v443_v2  ;;  %v244_v17 = vld [vmem:[%s211_s5] sm:$0x3]  ;;  %s446_s10 = sld [smem:[#allocation3 + $0x2]]  ;;  %v296_v26 = vshrl.u32 %v295_v21, 7  ;;  %v300_v34 = vand.u32 127, %v295_v21  ;;  %s448_s13 = sshll.u32 %s677_s18, 5 }
  0x44   : > { %vm256_vm0 = vcmp.eq.s32.totalorder %v244_v17, 0  ;;  %vm266_vm1 = vcmp.eq.s32.totalorder %v244_v17, 1  ;;  %vm276_vm2 = vcmp.eq.s32.totalorder %v244_v17, 2  ;;  %s323_s14 = sshll.u32 %s839_s7, 4  ;;  %s321_s9 = scalar_lea.hbm %s888_s3, %s448_s13  ;;  %s324_s14 = int_to_ptr.vmem [resolvable:$true] %s323_s14 }
  0x45   : > { %v251_v5 = vmax.f32 %v248_v3, %v444_v4  ;;  %v257_v19 = vsel %vm256_vm0, %v245_v1, 0.0  ;;  %v301_v35 = vmul.u32 128, %v296_v26  ;;  %s309_s11 = scalar_lea.sflag [#allocation6], %s825_s30  ;;  %s599_s12 = scalar_lea.vmem %s324_s14, 32 }
  0x46   : > { %v267_v24 = vsel %vm266_vm1, %v443_v2, %v257_v19  ;;  %p600_p8 = scmp.ne.s32.totalorder %s324_s14, %s599_s12  ;;  %s693_s23 = smov [#allocation9]  }
  0x47   : > { %v252_v6 = vsub.f32 %v245_v1, %v251_v5  ;;  %v262_v7 = vsub.f32 %v443_v2, %v251_v5  ;;  %v272_v8 = vsub.f32 %v444_v4, %v251_v5  ;;  %v260_v18 = vstv %s259_s26  ;;  %s603_s24 = sshll.u32 %s693_s23, 4  ;;  %s604_s24 = int_to_ptr.vmem [resolvable:$false] %s603_s24 }
  0x48   : > { %v261_v22 = vsel %vm256_vm0, %v260_v18, 0.0  ;;  %v270_v23 = vstv %s445_s8  ;;  %v277_v29 = vsel %vm276_vm2, %v444_v4, %v267_v24  ;;  %v302_v41 = vadd.s32 %v301_v35, %v300_v34  ;;  %p601_p0 = pnand %p600_p8, %p768_p9  ;;  %s605_s25 = scalar_lea.vmem %s604_s24, 64 }
  0x49   : > { %v253_v9 = vmul.f32 1.442695, %v252_v6  ;;  %v263_v10 = vmul.f32 1.442695, %v262_v7  ;;  %v273_v11 = vmul.f32 1.442695, %v272_v8  ;;  %v271_v27 = vsel %vm266_vm1, %v270_v23, %v261_v22  ;;  %p606_p4 = scmp.lt.s32.totalorder %s324_s14, %s604_s24  ;;  %p607_p5 = scmp.lt.s32.totalorder %s605_s25, %s599_s12 }
  0x4a   : > { %v280_v28 = vstv %s446_s10  ;;  %v284_v37 = vsub.f32 %v277_v29, %v251_v5  ;;  %vm303_vm3 = vcmp.lt.s32.totalorder %v302_v41, 256  ;;  %v305_v46 = vld [vmem:[%s839_s7] sm:$0x3]  ;;  %p602_p2 = pneg %p601_p0 }
  0x4b   : > { %525 = vpow2.f32 %v253_v9  ;;  %v281_v33 = vsel %vm276_vm2, %v280_v28, %v271_v27  ;;  %p608_p6 = por %p607_p5, %p606_p4 }
  0x4c   : > { %527 = vpow2.f32 %v263_v10  ;;  %v290_v40 = vsub.f32 0.0, %v281_v33 }
  0x4d   : > { %529 = vpow2.f32 %v273_v11  ;;  %p609_p7 = pnand %p608_p6, %p602_p2 }
  0x58   : > { %v526_v12 = vpop.eup %525 }
  0x59   : > { %v528_v13 = vpop.eup %527  ;;  %v258_v20 = vsel %vm256_vm0, %v526_v12, 0.0 }
  0x5a   : > { %v530_v14 = vpop.eup %529  ;;  %v265_v15 = vadd.f32 %v528_v13, %v526_v12  ;;  %v268_v25 = vsel %vm266_vm1, %v528_v13, %v258_v20 }
  0x5b   : > { %v278_v30 = vsel %vm276_vm2, %v530_v14, %v268_v25 }
  0x5c   : > { %v275_v16 = vadd.f32 %v530_v14, %v265_v15 }
  0x5e   : > { %531 = vlog2.f32 %v275_v16 }
  0x5f   : > { %533 = vrcp.f32 %v275_v16 }
  0x6b   : > { %v532_v31 = vpop.eup %531 }
  0x6c   : > { %v534_v32 = vpop.eup %533  ;;  %v283_v36 = vmul.f32 0.6931472, %v532_v31 }
  0x6d   : > { %v287_v38 = vmul.f32 %v534_v32, %v278_v30 }
  0x6e   : > { %v285_v42 = vsub.f32 %v284_v37, %v283_v36 }
  0x6f   : > { %v288_v39 = vsub.f32 1.0, %v287_v38 }
  0x71   : > { %v289_v43 = vmul.f32 %v288_v39, %v288_v39 }
  0x73   : > { %v291_v44 = vmul.f32 %v290_v40, %v289_v43 }
  0x75   : > { %v292_v45 = vmul.f32 %v291_v44, %v285_v42 }
  0x77   : > { %v304_v47 = vsel %vm303_vm3, %v292_v45, 0.0 }
  0x78   : > { %v306_v48 = vadd.f32 %v305_v46, %v304_v47 }
  0x7a   : > { %307 = vst [vmem:[%s839_s7] sm:$0x3] %v306_v48 }
  0x7b   : > { %612 = shalt.err (!%p609_p7)
}
  0x7c   : > { %s613_s18 = scalar_lea.hbm %s321_s9, 32  ;;  %s617_s4 = scalar_lea.hbm %s888_s3, 64 }
  0x7d   : > { %p614_p1 = scmp.ne.s32.totalorder %s321_s9, %s613_s18  ;;  %p618_p3 = scmp.lt.s32.totalorder %s321_s9, %s888_s3 }
  0x7e   : > { %p619_p8 = scmp.lt.s32.totalorder %s617_s4, %s613_s18 }
  0x7f   : > { %p615_p10 = pnand %p614_p1, %p768_p9 }
  0x80   : > { %p620_p0 = por %p619_p8, %p618_p3 }
  0x81   : > { %p616_p13 = pneg %p615_p10 }
  0x83   : > { %p621_p12 = pnand %p620_p0, %p616_p13 }
  0x85   : > { %624 = shalt.err (!%p621_p12)
}
  0x86   : > { %458 = dma.vmem_to_hbm [thread:$0]  (%p768_p9), %s324_s14, 32, %s321_s9, %s309_s11  }
  0x87 PF: > { %s335_s26 = sand.u32 1, %s665_s15   ;;  %p895_p2 = scmp.ge.s32.totalorder %s685_s0, 2 }
  0x88   : > { %s336_s8 = scalar_lea.sflag [#allocation6], %s335_s26 }
  0x89   : > { %p468_p4 = pnand %p895_p2, %p775_p11 }
  0x8b   : > { %p469_p5 = pneg %p468_p4 }
  0x8d   : > { %660 = dma.done.wait (%p469_p5), %s336_s8, 32  }
  0x8e   : > { %662 = vsyncadd (%p469_p5), %s336_s8, 4294967264  ;;  %s26_s0 = sadd.s32 1, %s685_s0   ;;  %s896_s15 = smov %s669_s16 }
  0x8f   : > { %p23_p6 = scmp.ge.s32.totalorder %s26_s0, 4   ;;  %s897_s16 = smov %s673_s17 }
  0x90   : > { %s898_s17 = smov %s773_s28  ;;  %s899_s18 = smov %s681_s19 }
  0x91   : > { %s900_s19 = smov %s902_s22  ;;  %25 = sbr.rel (!%p23_p6) target bundleno = 13 (0xd), region = 92 }
  0x96   :  { %341 = vsyncpa [#allocation5], 1 }
  0x97   :  { %343 = vsyncpa [#allocation5 + $0x1], 1 }
  0x98   :  { %344 = vsyncpa [#allocation8], 1 }
  0x99   :  { %346 = vsyncpa [#allocation8 + $0x1], 1 }
  0x9a   :  { %347 = vsyncpa [#allocation6], 1 }
  0x9b   :  { %349 = vsyncpa [#allocation6 + $0x1], 1 }

</bundles_post_ra>
